<compile_context>
chip_gen: v6e
topology: v6e:2x2x1
jax: 0.10.0
libtpu: 0.0.40
codegen_flags: <defaults>
</compile_context>

<pallas_src>
import numpy as np
import jax
import jax.numpy as jnp
from jax import lax
from jax.experimental import pallas as pl
from jax.experimental.pallas import tpu as pltpu


def self_attention_kernel(gamma_ref, xfull_ref, xtile_ref, w_ref, b_ref,
                          o_ref, q_ref, v_ref):
    # xfull_ref block: (1, C, N)   -- resident across all j tiles of a batch
    # xtile_ref block: (1, C, TJ)  -- this step's key/output column tile (f32)
    # w_ref: (3C, C) bf16 stacked [Wk; Wq; Wv], b_ref: (3C, 1) f32 [bk; bq; bv]
    # q_ref / v_ref scratch: (C, N) bf16 caches of the Q / V projections
    C = xtile_ref.shape[1]
    j = pl.program_id(1)

    # --- fused Q/V projection, once per batch element (first key tile) ------
    @pl.when(j == 0)
    def _():
        x_full = xfull_ref[0].astype(jnp.bfloat16)                  # (C, N)
        qv = (jnp.dot(w_ref[C:3 * C, :], x_full,
                      preferred_element_type=jnp.float32)
              + b_ref[C:3 * C, :])                                   # (2C, N) f32
        q_ref[...] = qv[0:C, :].astype(jnp.bfloat16)
        v_ref[...] = qv[C:2 * C, :].astype(jnp.bfloat16)

    x_tile = xtile_ref[0]                                            # (C, TJ) f32

    # --- K projection for this column tile only (bf16 MXU, f32 accumulate) --
    k_tile = (jnp.dot(w_ref[0:C, :], x_tile.astype(jnp.bfloat16),
                      preferred_element_type=jnp.float32)
              + b_ref[0:C, :])                                       # (C, TJ) f32

    q = q_ref[...]                                                   # (C, N) bf16
    v = v_ref[...]                                                   # (C, N) bf16

    # --- transposed scores: sT[jj, i] = sum_c k[c, jj] * q[c, i] -------------
    # dot_general contracts the channel axes directly on the MXU (no explicit
    # q.T copy); bf16 inputs, f32 accumulation.
    sT = lax.dot_general(
        k_tile.astype(jnp.bfloat16), q,
        dimension_numbers=(((0,), (0,)), ((), ())),
        preferred_element_type=jnp.float32)                          # (TJ, N)

    # torch F.softmax(query_key, dim=1) == normalize over i == LAST axis of sT
    # (lane-axis reductions).  Softmax elementwise math stays in f32.
    m = jnp.max(sT, axis=-1, keepdims=True)                          # (TJ, 1)
    e = jnp.exp(sT - m)                                              # (TJ, N) f32
    e_b = e.astype(jnp.bfloat16)

    # Deferred normalization: feed un-normalized e into the V matmul, and get
    # the per-column denominators directly in lane layout via a ones-row MXU
    # matmul; then scale only the small (C, TJ) output instead of the (TJ, N)
    # block.  Denominator and numerator share the same bf16 e, so the rounding
    # error largely cancels.
    ones_row = jnp.ones((1, q.shape[1]), jnp.bfloat16)
    denom = lax.dot_general(
        ones_row, e_b,
        dimension_numbers=(((1,), (1,)), ((), ())),
        preferred_element_type=jnp.float32)                          # (1, TJ)
    out = lax.dot_general(
        v, e_b,
        dimension_numbers=(((1,), (1,)), ((), ())),
        preferred_element_type=jnp.float32)                          # (C, TJ)

    # gamma * (V @ attn) + input  (residual uses the exact f32 input tile)
    scale = gamma_ref[0, 0] * pl.reciprocal(denom, approx=False)     # (1, TJ)
    o_ref[0] = (out * scale + x_tile).astype(o_ref.dtype)


def _vmem_budget_bytes():
    # Chip-derived scoped-VMEM budget: ~78% of capacity leaves headroom for the
    # compiler's own buffers (≈50 MiB on v7x's 64 MiB, ≈100 MiB on v5e/v6e's
    # 128 MiB).  Fall back to a v7x-safe value if the query is unavailable.
    cap = 64 * 1024 * 1024
    try:
        info = pltpu.get_tpu_info()
        cap = int(getattr(info, "vmem_capacity_bytes", cap))
    except Exception:
        pass
    return int(cap * 0.78)


def _pick_block_j(n, c, vmem_budget):
    # Largest lane-aligned (multiple of 128) tile that divides N and whose
    # (TJ, N) score working set (~10 bytes/elem: f32 scores + f32 exp + bf16
    # exp) fits the scoped-VMEM budget after the resident buffers.
    if n % 128 != 0:
        return n  # single tile; every softmax column still lives in one tile
    resident = (2 * 4 * c * n          # f32 x_full (double-buffered)
                + 2 * 2 * c * n        # bf16 Q/V scratch
                + 2 * (2 * 3 * c * c + 4 * 3 * c)  # bf16 weights / f32 bias
                + (2 << 20))           # slack for compiler temporaries
    per_col = 10 * n + 6 * 4 * c       # score block rows + x/k/out columns
    tj_max = min(max((vmem_budget - resident) // per_col, 128), n)
    best = 128
    tj = 256
    while tj <= tj_max:
        if n % tj == 0:
            best = tj
        tj += 128
    return int(best)


def self_attention(x_nchw, wq, wk, wv, bq, bk, bv, gamma, *, block_j=None):
    B, C, H, W = x_nchw.shape
    N = H * W
    x = x_nchw.reshape(B, C, N)

    vmem_limit = _vmem_budget_bytes()
    TJ = _pick_block_j(N, C, vmem_limit) if block_j is None else block_j
    assert N % TJ == 0, "key-tile size must divide N"
    assert TJ == N or TJ % 128 == 0, "key-tile must be lane-aligned (x128)"
    NJ = N // TJ

    # Fused projection parameters.  K first so the hot per-tile slice starts at
    # row 0; Q/V (used once per batch element) sit above it.  Weights in bf16
    # (matmul inputs only); biases stay f32 and are added to f32 accumulators.
    w_fused = jnp.concatenate([wk, wq, wv], axis=0).astype(jnp.bfloat16)   # (3C, C)
    b_fused = jnp.concatenate([bk, bq, bv], axis=0).reshape(3 * C, 1).astype(jnp.float32)
    gamma_arr = jnp.asarray(gamma, jnp.float32).reshape(1, 1)

    # Advisory cost estimate for XLA scheduling around the kernel.
    flops = B * (6 * C * C * N + 4 * C * N * N)
    transcendentals = B * N * N
    bytes_accessed = 4 * 3 * B * C * N + 2 * 3 * C * C + 4 * 3 * C + 4

    out = pl.pallas_call(
        self_attention_kernel,
        out_shape=jax.ShapeDtypeStruct((B, C, N), x.dtype),
        grid_spec=pltpu.PrefetchScalarGridSpec(
            num_scalar_prefetch=0,
            grid=(B, NJ),
            in_specs=[
                pl.BlockSpec(memory_space=pltpu.MemorySpace.SMEM),   # gamma (1,1)
                pl.BlockSpec((1, C, N), lambda b, j: (b, 0, 0)),     # x full (per b)
                pl.BlockSpec((1, C, TJ), lambda b, j: (b, 0, j)),    # x key/out tile
                pl.BlockSpec((3 * C, C), lambda b, j: (0, 0)),       # fused W (bf16)
                pl.BlockSpec((3 * C, 1), lambda b, j: (0, 0)),       # fused bias (f32)
            ],
            out_specs=pl.BlockSpec((1, C, TJ), lambda b, j: (b, 0, j)),
            scratch_shapes=[pltpu.VMEM((C, N), jnp.bfloat16),        # Q cache
                            pltpu.VMEM((C, N), jnp.bfloat16)],       # V cache
        ),
        compiler_params=pltpu.CompilerParams(
            dimension_semantics=("parallel", "arbitrary"),
            vmem_limit_bytes=int(vmem_limit),
        ),
        cost_estimate=pl.CostEstimate(flops=flops,
                                      transcendentals=transcendentals,
                                      bytes_accessed=bytes_accessed),
    )(gamma_arr, x, x, w_fused, b_fused)
    return out.reshape(B, C, H, W)


# ------------------------- parameter setup (glue) --------------------------

def spectral_normalize(w, u):
    # Mirrors SpectralNorm.compute_weight: one power-iteration step, then w / sigma.
    v = w.T @ u
    v = v / jnp.linalg.norm(v)
    u2 = w @ v
    u2 = u2 / jnp.linalg.norm(u2)
    sigma = u2 @ w @ v
    return w / sigma


def make_params(key, C, gain=1.0):
    # nn.Conv1d(C, C, 1) weight shape (C, C, 1) -> squeeze to (C, C).
    # xavier_uniform: bound = gain * sqrt(6 / (fan_in + fan_out)), fan = C * 1.
    bound = gain * np.sqrt(6.0 / (C + C))
    kq, kk, kv, uq, uk, uv = jax.random.split(key, 6)
    wq = jax.random.uniform(kq, (C, C), jnp.float32, -bound, bound)
    wk = jax.random.uniform(kk, (C, C), jnp.float32, -bound, bound)
    wv = jax.random.uniform(kv, (C, C), jnp.float32, -bound, bound)
    # spectral-norm buffers u ~ N(0, 1) of size C_out
    wq = spectral_normalize(wq, jax.random.normal(uq, (C,), jnp.float32))
    wk = spectral_normalize(wk, jax.random.normal(uk, (C,), jnp.float32))
    wv = spectral_normalize(wv, jax.random.normal(uv, (C,), jnp.float32))
    bq = jnp.zeros((C,), jnp.float32)
    bk = jnp.zeros((C,), jnp.float32)
    bv = jnp.zeros((C,), jnp.float32)
    # torch init of gamma is 0.0; use a deterministic nonzero value so the
    # attention path is actually exercised by the numeric check.
    gamma = jnp.float32(0.5)
    return wq, wk, wv, bq, bk, bv, gamma


def reference(x_nchw, wq, wk, wv, bq, bk, bv, gamma):
    B, C, H, W = x_nchw.shape
    x = x_nchw.reshape(B, C, -1)
    q = jnp.einsum('oc,bcn->bon', wq, x) + bq[None, :, None]
    k = jnp.einsum('oc,bcn->bon', wk, x) + bk[None, :, None]
    v = jnp.einsum('oc,bcn->bon', wv, x) + bv[None, :, None]
    s = jnp.einsum('bcn,bcm->bnm', q, k)           # query.permute(0,2,1) @ key
    attn = jax.nn.softmax(s, axis=1)               # F.softmax(., dim=1)
    out = jnp.einsum('bcn,bnm->bcm', v, attn)      # value @ attn
    out = gamma * out + x
    return out.reshape(B, C, H, W)


if __name__ == "__main__":
    key = jax.random.PRNGKey(0)
    kx, kp = jax.random.split(key)

    B, C, H, W = 2, 4, 16, 16
    x = jax.random.normal(kx, (B, C, H, W), jnp.float32)
    wq, wk, wv, bq, bk, bv, gamma = make_params(kp, C)

    # block_j=128 forces a multi-tile key axis (N=256 -> 2 tiles) so the
    # tiled / per-tile-softmax / scratch-carry path is exercised.
    out = self_attention(x, wq, wk, wv, bq, bk, bv, gamma, block_j=128)
    out = jax.block_until_ready(out)

    ref = reference(x, wq, wk, wv, bq, bk, bv, gamma)
    # bf16 matmul inputs (f32 accumulation) -> relaxed tolerance vs f32 torch math.
    np.testing.assert_allclose(np.asarray(out), np.asarray(ref),
                               rtol=3e-2, atol=3e-2)

    print("KERNEL_OK")
</pallas_src>

<mosaic_0001>
module attributes {stable_mosaic.version = 11 : i64} {
  func.func @self_attention_kernel(%arg0: i32, %arg1: i32, %arg2: memref<1x1xf32, #tpu.memory_space<smem>>, %arg3: memref<1x4x256xf32, #tpu.memory_space<vmem>>, %arg4: memref<1x4x128xf32, #tpu.memory_space<vmem>>, %arg5: memref<12x4xbf16, #tpu.memory_space<vmem>>, %arg6: memref<12x1xf32, #tpu.memory_space<vmem>>, %arg7: memref<1x4x128xf32, #tpu.memory_space<vmem>>, %arg8: memref<4x256xbf16, #tpu.memory_space<vmem>>, %arg9: memref<4x256xbf16, #tpu.memory_space<vmem>>) attributes {dimension_semantics = [#tpu.dimension_semantics<parallel>, #tpu.dimension_semantics<arbitrary>], iteration_bounds = array<i64: 2, 2>, scalar_prefetch = 0 : i64, scratch_operands = 2 : i64, tpu.core_type = #tpu.core_type<tc>, window_params = [{transform_indices = @transform_0, window_bounds = array<i64: 1, 1>}, {transform_indices = @transform_1, window_bounds = array<i64: 1, 4, 256>}, {transform_indices = @transform_2, window_bounds = array<i64: 1, 4, 128>}, {pipeline_mode = #tpu.pipeline_mode<synchronous>, transform_indices = @transform_3, window_bounds = array<i64: 12, 4>}, {pipeline_mode = #tpu.pipeline_mode<synchronous>, transform_indices = @transform_4, window_bounds = array<i64: 12, 1>}, {transform_indices = @transform_5, window_bounds = array<i64: 1, 4, 128>}]} {
    %c0_i32 = arith.constant 0 : i32
    %0 = arith.cmpi eq, %arg1, %c0_i32 : i32
    %1 = arith.extui %0 : i1 to i32
    %c0_i32_0 = arith.constant 0 : i32
    %2 = arith.cmpi ne, %1, %c0_i32_0 : i32
    scf.if %2 {
      %c0_21 = arith.constant 0 : index
      %c0_22 = arith.constant 0 : index
      %c0_23 = arith.constant 0 : index
      %34 = vector.load %arg3[%c0_21, %c0_22, %c0_23] : memref<1x4x256xf32, #tpu.memory_space<vmem>>, vector<1x4x256xf32>
      %35 = vector.shape_cast %34 : vector<1x4x256xf32> to vector<4x256xf32>
      %36 = arith.truncf %35 : vector<4x256xf32> to vector<4x256xbf16>
      %c4 = arith.constant 4 : index
      %c0_24 = arith.constant 0 : index
      %37 = vector.load %arg5[%c4, %c0_24] : memref<12x4xbf16, #tpu.memory_space<vmem>>, vector<8x4xbf16>
      %cst_25 = arith.constant dense<0.000000e+00> : vector<8x256xf32>
      %38 = tpu.matmul %37, %36, %cst_25 {dimension_numbers = #tpu.dot_dimension_numbers<[1], [0], [0], [1], [0, 0, 1, 1], [], []>} : vector<8x4xbf16>, vector<4x256xbf16>, vector<8x256xf32> -> vector<8x256xf32>
      %c4_26 = arith.constant 4 : index
      %c0_27 = arith.constant 0 : index
      %39 = vector.load %arg6[%c4_26, %c0_27] : memref<12x1xf32, #tpu.memory_space<vmem>>, vector<8x1xf32>
      %40 = vector.broadcast %39 : vector<8x1xf32> to vector<8x256xf32>
      %41 = arith.addf %38, %40 : vector<8x256xf32>
      %42 = vector.extract_strided_slice %41 {offsets = [0, 0], sizes = [4, 256], strides = [1, 1]} : vector<8x256xf32> to vector<4x256xf32>
      %43 = arith.truncf %42 : vector<4x256xf32> to vector<4x256xbf16>
      %c0_28 = arith.constant 0 : index
      %c0_29 = arith.constant 0 : index
      %44 = vector.load %arg8[%c0_28, %c0_29] : memref<4x256xbf16, #tpu.memory_space<vmem>>, vector<4x256xbf16>
      tpu.vector_store %arg8[%c0_28, %c0_29], %43 {strides = array<i32>} : memref<4x256xbf16, #tpu.memory_space<vmem>>, vector<4x256xbf16>,
      %45 = vector.extract_strided_slice %41 {offsets = [4, 0], sizes = [4, 256], strides = [1, 1]} : vector<8x256xf32> to vector<4x256xf32>
      %46 = arith.truncf %45 : vector<4x256xf32> to vector<4x256xbf16>
      %c0_30 = arith.constant 0 : index
      %c0_31 = arith.constant 0 : index
      %47 = vector.load %arg9[%c0_30, %c0_31] : memref<4x256xbf16, #tpu.memory_space<vmem>>, vector<4x256xbf16>
      tpu.vector_store %arg9[%c0_30, %c0_31], %46 {strides = array<i32>} : memref<4x256xbf16, #tpu.memory_space<vmem>>, vector<4x256xbf16>,
    } else {
    }
    %c0 = arith.constant 0 : index
    %c0_1 = arith.constant 0 : index
    %c0_2 = arith.constant 0 : index
    %3 = vector.load %arg4[%c0, %c0_1, %c0_2] : memref<1x4x128xf32, #tpu.memory_space<vmem>>, vector<1x4x128xf32>
    %4 = vector.shape_cast %3 : vector<1x4x128xf32> to vector<4x128xf32>
    %c0_3 = arith.constant 0 : index
    %c0_4 = arith.constant 0 : index
    %5 = vector.load %arg5[%c0_3, %c0_4] : memref<12x4xbf16, #tpu.memory_space<vmem>>, vector<4x4xbf16>
    %6 = arith.truncf %4 : vector<4x128xf32> to vector<4x128xbf16>
    %cst = arith.constant dense<0.000000e+00> : vector<4x128xf32>
    %7 = tpu.matmul %5, %6, %cst {dimension_numbers = #tpu.dot_dimension_numbers<[1], [0], [0], [1], [0, 0, 1, 1], [], []>} : vector<4x4xbf16>, vector<4x128xbf16>, vector<4x128xf32> -> vector<4x128xf32>
    %c0_5 = arith.constant 0 : index
    %c0_6 = arith.constant 0 : index
    %8 = vector.load %arg6[%c0_5, %c0_6] : memref<12x1xf32, #tpu.memory_space<vmem>>, vector<4x1xf32>
    %9 = vector.broadcast %8 : vector<4x1xf32> to vector<4x128xf32>
    %10 = arith.addf %7, %9 : vector<4x128xf32>
    %c0_7 = arith.constant 0 : index
    %c0_8 = arith.constant 0 : index
    %11 = vector.load %arg8[%c0_7, %c0_8] : memref<4x256xbf16, #tpu.memory_space<vmem>>, vector<4x256xbf16>
    %c0_9 = arith.constant 0 : index
    %c0_10 = arith.constant 0 : index
    %12 = vector.load %arg9[%c0_9, %c0_10] : memref<4x256xbf16, #tpu.memory_space<vmem>>, vector<4x256xbf16>
    %13 = arith.truncf %10 : vector<4x128xf32> to vector<4x128xbf16>
    %cst_11 = arith.constant dense<0.000000e+00> : vector<128x256xf32>
    %14 = tpu.matmul %13, %11, %cst_11 {dimension_numbers = #tpu.dot_dimension_numbers<[0], [0], [1], [1], [0, 1, 1, 1], [], []>} : vector<4x128xbf16>, vector<4x256xbf16>, vector<128x256xf32> -> vector<128x256xf32>
    %cst_12 = arith.constant dense<0xFF800000> : vector<128xf32>
    %15 = vector.multi_reduction <maximumf>, %14, %cst_12 [1] : vector<128x256xf32> to vector<128xf32>
    %16 = vector.shape_cast %15 : vector<128xf32> to vector<128x1xf32>
    %17 = vector.broadcast %16 : vector<128x1xf32> to vector<128x256xf32>
    %18 = arith.subf %14, %17 : vector<128x256xf32>
    %19 = math.exp %18 : vector<128x256xf32>
    %20 = arith.truncf %19 : vector<128x256xf32> to vector<128x256xbf16>
    %cst_13 = arith.constant 1.000000e+00 : bf16
    %21 = vector.broadcast %cst_13 : bf16 to vector<1x256xbf16>
    %cst_14 = arith.constant dense<0.000000e+00> : vector<1x128xf32>
    %22 = tpu.matmul %21, %20, %cst_14 {dimension_numbers = #tpu.dot_dimension_numbers<[1], [1], [0], [0], [0, 0, 1, 0], [], []>} : vector<1x256xbf16>, vector<128x256xbf16>, vector<1x128xf32> -> vector<1x128xf32>
    %cst_15 = arith.constant dense<0.000000e+00> : vector<4x128xf32>
    %23 = tpu.matmul %12, %20, %cst_15 {dimension_numbers = #tpu.dot_dimension_numbers<[1], [1], [0], [0], [0, 0, 1, 0], [], []>} : vector<4x256xbf16>, vector<128x256xbf16>, vector<4x128xf32> -> vector<4x128xf32>
    %c0_16 = arith.constant 0 : index
    %c0_17 = arith.constant 0 : index
    %24 = memref.load %arg2[%c0_16, %c0_17] : memref<1x1xf32, #tpu.memory_space<smem>>
    %25 = tpu.reciprocal %22 : vector<1x128xf32> -> vector<1x128xf32>
    %26 = vector.broadcast %24 : f32 to vector<1x128xf32>
    %27 = arith.mulf %26, %25 : vector<1x128xf32>
    %28 = vector.broadcast %27 : vector<1x128xf32> to vector<4x128xf32>
    %29 = arith.mulf %23, %28 : vector<4x128xf32>
    %30 = arith.addf %29, %4 : vector<4x128xf32>
    %c0_18 = arith.constant 0 : index
    %c0_19 = arith.constant 0 : index
    %c0_20 = arith.constant 0 : index
    %31 = vector.load %arg7[%c0_18, %c0_19, %c0_20] : memref<1x4x128xf32, #tpu.memory_space<vmem>>, vector<1x4x128xf32>
    %32 = vector.shape_cast %31 : vector<1x4x128xf32> to vector<4x128xf32>
    %33 = vector.shape_cast %30 : vector<4x128xf32> to vector<1x4x128xf32>
    tpu.vector_store %arg7[%c0_18, %c0_19, %c0_20], %33 {strides = array<i32>} : memref<1x4x128xf32, #tpu.memory_space<vmem>>, vector<1x4x128xf32>,
    return
  }
  func.func @transform_0(%arg0: i32, %arg1: i32) -> (i32, i32) {
    %c0_i32 = arith.constant 0 : i32
    %c0_i32_0 = arith.constant 0 : i32
    %c0_i32_1 = arith.constant 0 : i32
    return %c0_i32, %c0_i32_0 : i32, i32
  }
  func.func @transform_1(%arg0: i32, %arg1: i32) -> (i32, i32, i32) {
    %c0_i32 = arith.constant 0 : i32
    %c0_i32_0 = arith.constant 0 : i32
    %c0_i32_1 = arith.constant 0 : i32
    return %arg0, %c0_i32, %c0_i32_0 : i32, i32, i32
  }
  func.func @transform_2(%arg0: i32, %arg1: i32) -> (i32, i32, i32) {
    %c0_i32 = arith.constant 0 : i32
    %c0_i32_0 = arith.constant 0 : i32
    return %arg0, %c0_i32, %arg1 : i32, i32, i32
  }
  func.func @transform_3(%arg0: i32, %arg1: i32) -> (i32, i32) {
    %c0_i32 = arith.constant 0 : i32
    %c0_i32_0 = arith.constant 0 : i32
    %c0_i32_1 = arith.constant 0 : i32
    return %c0_i32, %c0_i32_0 : i32, i32
  }
  func.func @transform_4(%arg0: i32, %arg1: i32) -> (i32, i32) {
    %c0_i32 = arith.constant 0 : i32
    %c0_i32_0 = arith.constant 0 : i32
    %c0_i32_1 = arith.constant 0 : i32
    return %c0_i32, %c0_i32_0 : i32, i32
  }
  func.func @transform_5(%arg0: i32, %arg1: i32) -> (i32, i32, i32) {
    %c0_i32 = arith.constant 0 : i32
    %c0_i32_0 = arith.constant 0 : i32
    return %arg0, %c0_i32, %arg1 : i32, i32, i32
  }
}

</mosaic_0001>

<bundles_post_ra>
// kernel: tpu_custom_call.1
= control target key start
LH: loop header
LB: loop body
LE: loop exit
PB: predicated region body
PF: predicated region fallthrough
CT: control target
= control target key end

     0   :  { %s1651_s0 = inlined_call_operand.<no memory space> [shape: f32[1,1], index: 0, kind: input, shape index: {}]   ;;  %s1652_s1 = inlined_call_operand.vmem [shape: f32[2,4,256], index: 1, kind: input, shape index: {}]   ;;  %s1653_s2 = inlined_call_operand.hbm [shape: f32[2,4,256], index: 2, kind: input, shape index: {}]   ;;  %s1654_s3 = inlined_call_operand.vmem [shape: bf16[12,4], index: 3, kind: input, shape index: {}]   ;;  %s1655_s4 = inlined_call_operand.vmem [shape: f32[12,1], index: 4, kind: input, shape index: {}]   ;;  %s1656_s5 = inlined_call_operand.hbm [shape: f32[2,4,256], index: 5, kind: output, shape index: {}]  }
   0x1   :  { %10 = sst [smem:[#allocation4]] %s1651_s0 }
   0x2   :  { %11 = vsyncpa [#allocation6], 0 }
   0x3   :  { %13 = vsyncpa [#allocation6 + $0x1], 0 }
   0x4   :  { %14 = vsyncpa [#allocation7], 0 }
   0x5   :  { %16 = vsyncpa [#allocation7 + $0x1], 0  ;;  %s1342_s20 = smov 0   ;;  %s1344_s21 = smov 0  }
   0x6   :  { %s1346_s22 = smov 0   ;;  %s1348_s23 = smov 0  }
   0x7   :  { %s1350_s24 = smov 0   ;;  %s1352_s25 = smov 0  }
   0x8   :  { %s1354_s26 = smov 0   ;;  %s1356_s27 = smov 0  }
   0x9 LB: > { %s977_s0 = sadd.s32 4294967295, %s1299_s27   ;;  %s978_s28 = sadd.s32 4294967294, %s1299_s27   ;;  %s1299_s27 = sphi %s1356_s27, %s22_s27   ;;  %s1295_s26 = sphi %s1354_s26, %s1675_s26   ;;  %s1291_s25 = sphi %s1352_s25, %s1674_s25   ;;  %s1287_s24 = sphi %s1350_s24, %s1673_s24   ;;  %s1283_s23 = sphi %s1348_s23, %s1672_s23   ;;  %s1279_s22 = sphi %s1346_s22, %s1671_s22   ;;  %s1275_s21 = sphi %s1344_s21, %s1670_s21   ;;  %s1271_s20 = sphi %s1342_s20, %s1669_s20  }
   0xa   : > { %s31_s29 = sadd.s32 1, %s1291_s25  ;;  %s34_s30 = sadd.s32 1, %s1295_s26 }
   0xb   : > { %p32_p0 = scmp.ge.s32.totalorder %s31_s29, 2  ;;  %s90_s6 = sadd.s32 1, %s1279_s22 }
   0xc   : > { %p97_p1 = scmp.ne.s32.totalorder %s1279_s22, %s1275_s21  ;;  %p98_p2 = scmp.eq.s32.totalorder %s1299_s27, 0 }
   0xd   : > { %s1677_s29 = smov (%p32_p0, %s31_s29), 0  ;;  %s1679_s30 = smov (!%p32_p0, %s34_s30), %s1295_s26 }
   0xe   : > { %1659 = sst [smem:[#allocation11_spill]] %s1677_s29  ;;  %s86_s7 = ssub.s32 %s1291_s25, %s1677_s29 }
   0xf   : > { %p1395_p3 = por %p98_p2, %p97_p1  ;;  %p36_p4 = scmp.ge.s32.totalorder %s1679_s30, 2 }
  0x10   : > { %p103_p5 = scmp.ne.s32.totalorder %s1275_s21, %s1271_s20  ;;  %p104_p6 = scmp.eq.s32.totalorder %s977_s0, 0 }
  0x11   : > { %p171_p7 = scmp.eq.s32.totalorder %s977_s0, 3  ;;  %s1681_s30 = smov (%p36_p4, %s1679_s30), 0 }
  0x12   : > { %1661 = sst [smem:[#allocation12_spill]] %s1681_s30  ;;  %p1403_p8 = por %p104_p6, %p103_p5 }
  0x13   : > { %p1407_p9 = por %p171_p7, %p97_p1  ;;  %s85_s11 = ssub.s32 %s1295_s26, %s1681_s30 }
  0x14   : > { %p177_p10 = scmp.eq.s32.totalorder %s978_s28, 3  ;;  %s87_s12 = sor.u32 %s86_s7, %s85_s11 }
  0x15   : > { %p88_p11 = scmp.eq.s32.totalorder %s87_s12, 0  ;;  %p1033_p13 = scmp.lt.s32.totalorder %s1299_s27, 4 }
  0x16   : > { %p1413_p12 = por %p177_p10, %p103_p5  ;;  %s214_s14 = sand.u32 1, %s1279_s22  }
  0x17   : > { %s1420_s15 = scalar_select %p88_p11, %s1279_s22, %s90_s6  }
  0x18   : > { %s1664_s13 = scalar_select %p1413_p12, 1, 0 }
  0x19   : > { %s981_s16 = sshll.u32 %s214_s14, 2  ;;  %s982_s17 = sshll.u32 %s1295_s26, 1 }
  0x1a   : > { %s223_s18 = sadd.s32 %s1291_s25, %s982_s17  ;;  %s218_s19 = scalar_lea.vmem [#allocation5], %s981_s16 }
  0x1b   : > { %s227_s0 = sshll.u32 %s218_s19, 4  ;;  %s983_s30 = sshll.u32 %s223_s18, 6  ;;  %s228_s0 = int_to_ptr.vmem [resolvable:$true] %s227_s0 }
  0x1c   : > { %s225_s7 = scalar_lea.hbm %s1653_s2, %s983_s30  ;;  %p1429_p0 = pnand %p1033_p13, %p1395_p3 }
  0x1d   : > { %p984_p1 = scmp.ge.s32.totalorder %s1299_s27, 1  ;;  %p232_p2 = scmp.lt.s32.totalorder %s1299_s27, 5 }
  0x1e   : > { %s215_s6 = scalar_lea.sflag [#allocation6], %s214_s14  ;;  %p1177_p4 = pneg %p1429_p0 }
  0x1f   : > { %s1188_s12 = scalar_lea.vmem %s228_s0, 64  ;;  %s1301_s16 = smov [#allocation5]  }
  0x20   : > { %p1189_p5 = scmp.ne.s32.totalorder %s228_s0, %s1188_s12  ;;  %s1193_s17 = sshll.u32 %s1301_s16, 4  ;;  %s1194_s17 = int_to_ptr.vmem [resolvable:$false] %s1193_s17 }
  0x21   : > { %s1195_s29 = scalar_lea.vmem %s1194_s17, 128  ;;  %p1196_p10 = scmp.lt.s32.totalorder %s228_s0, %s1194_s17 }
  0x22   : > { %p1191_p6 = pnand %p1189_p5, %p1177_p4  ;;  %p1197_p11 = scmp.lt.s32.totalorder %s1195_s29, %s1188_s12 }
  0x24   : > { %p1192_p7 = pneg %p1191_p6  ;;  %p1198_p3 = por %p1197_p11, %p1196_p10 }
  0x26   : > { %p1199_p13 = pnand %p1198_p3, %p1192_p7 }
  0x28   : > { %1202 = shalt.err (!%p1199_p13)
}
  0x29   : > { %1028 = dma.hbm_to_vmem [thread:$0]  (!%p1429_p0), %s225_s7, 64, %s228_s0, %s215_s6  }
  0x2a   : > { %p233_p12 = pnand %p984_p1, %p232_p2 }
  0x2b   : > { %s1444_s30 = sand.u32 (!%p233_p12), 1, %s1275_s21  }
  0x2c   : > { %236 = sbr.rel (%p233_p12) target bundleno = 1282 (0x502), region = 40  ;;  %s985_s8 = sshll.u32 (!%p233_p12), %s1444_s30, 2 }
  0x2d   : > { %s239_s14 = scalar_lea.sflag (!%p233_p12), [#allocation6], %s1444_s30  ;;  %s1448_s18 = scalar_lea.vmem (!%p233_p12), [#allocation5], %s985_s8 }
  0x31   : > { %1262 = dma.done.wait (%p1403_p8), %s239_s14, 64  }
  0x32   : > { %1264 = vsyncadd (%p1403_p8), %s239_s14, 4294967232  ;;  %p274_p0 = scmp.lt.s32.totalorder %s1287_s24, 1  ;;  %s1459_s6 = scalar_lea.vmem [#allocation8], %s985_s8 }
  0x33   : > { %p989_p12 = scmp.ne.s32.totalorder %s1283_s23, 0 }
  0x34   : > { %s275_s19 = scalar_select %p274_p0, %s1287_s24, 1 }
  0x35   : > { %284 = sbr.rel (%p989_p12) target bundleno = 271 (0x10f), region = 48 }
  0x36   : > { %s1012_s0 = sshll.u32 %s275_s19, 3 }
  0x37   : > { %s278_s11 = scalar_lea.vmem %s1652_s1, %s1012_s0 }
  0x3a   : > { %v285_v0 = vld [vmem:[%s278_s11] sm:$0xff]  ;;  %vm309_vm0 = vcmask 1041408   ;;  %v1302_v3 = vmov 0   ;;  %vm305_vm1 = vcmask 31744   ;;  %v1303_v9 = vmov 1983009808  }
  0x3b   : > { %v287_v1 = vcombine.high %v285_v0, %v285_v0  ;;  %v289_v2 = vpack.c.bf16 %v285_v0, %v285_v0  ;;  %348 = vmatprep.mubr.bf16.mxu0 %v1302_v3  ;;  %v1107_v4 = vld [vmem:[%s1654_s3] sm:$0x3c]   ;;  %1105 = vset.pattern.permute.xlu0 %v1302_v3  ;;  %v363_v10 = vunpack.c.l.s4 %v1303_v9  ;;  %v365_v11 = vlaneseq }
  0x3c   : > { %v293_v5 = vld [vmem:[%s1655_s4 + $0x4] sm:$0xff]  ;;  %v304_v8 = vrot.slane %v1107_v4, 2 }
  0x3d   : > { %296 = vperm.xlu0 %1105, %v293_v5   ;;  %v290_v6 = vpack.c.bf16 %v287_v1, %v287_v1  ;;  %v311_v7 = vsel %vm309_vm0, %v289_v2, 0  ;;  %v364_v12 = vunpack.c.0.s8 %v363_v10  ;;  %v366_v13 = vshrl.u32 %v365_v11, 7 }
  0x3f   : > { %991 = vmatprep.subr.msk.bf16.mxu0 %vm309_vm0, %v290_v6  ;;  %v367_v19 = vsub.s32 %v364_v12, %v366_v13 }
  0x40   : > { %331 = vmatpush1.bf16.msra.mxu0 %v311_v7 }
  0x43   : > { %992 = vmatmul.mubr.msk.bf16.vlgmr.msra.gmra.mxu0 %vm305_vm1, %v304_v8 }
  0xb8   : > { %v297_v14 = vpop.permute.xlu0 %296 }
 0x103   : > { %v350_v15 = vpop.f32.mrf.mxu0 }
 0x104   : > { %v351_v17 = vadd.f32 %v350_v15, %v297_v14 }
 0x105   : > { %v352_v16 = vpop.f32.mrf.mxu0 }
 0x106   : > { %v353_v18 = vadd.f32 %v352_v16, %v297_v14 }
 0x107   : > { %v354_v20 = vpop.f32.mrf.mxu0 }
 0x108   : > { %v993_v21 = vpack.c.bf16 %v353_v18, %v351_v17 }
 0x109   : > { %v355_v22 = vpop.f32.mrf.mxu0 }
 0x10a   : > { %v368_v23 = vrot.slane %v993_v21, %v367_v19  ;;  %994 = vst.sshfl [vmem:[#allocation2] sm:$0x33 pattern:$0x76325410] %v993_v21 }
 0x10c   : > { %v371_v24 = vcombine.high %v368_v23, %v368_v23 }
 0x10e   : > { %373 = vst [vmem:[#allocation3] sm:$0xf] %v371_v24 }
 0x10f PF: > { %v1469_v25 = vld [vmem:[%s1448_s18] sm:$0xf]  ;;  %vm387_vm2 = vcmask 1041408   ;;  %v1304_v26 = vmov 0.0   ;;  %vm1305_vm3 = vmmov 0   ;;  %v1306_v29 = vmov 0  }
 0x110   : > { %1015 = vmatprep.subr.bf16.mxu0 %v1304_v26  ;;  %v376_v27 = vpack.c.bf16 %v1469_v25, %v1469_v25  ;;  %1017 = vmatprep.mubr.msk.bf16.mxu0 %vm1305_vm3, %v1304_v26  ;;  %v377_v28 = vld [vmem:[%s1655_s4] sm:$0xf]  ;;  %vm383_vm4 = vcmask 31744   ;;  %s853_s19 = sld [smem:[#allocation4]]  ;;  %s1008_s0 = sshll.u32 %s1287_s24, 1 }
 0x111   : > { %1108 = vset.pattern.permute.xlu0 %v1306_v29  ;;  %521 = vmatprep.mubr.bf16.mxu1 %v1306_v29  ;;  %v375_v31 = vld [vmem:[%s1654_s3] sm:$0x3]  ;;  %s876_s28 = sadd.s32 %s1283_s23, %s1008_s0  ;;  %s880_s11 = sshll.u32 %s1459_s6, 4  ;;  %s881_s11 = int_to_ptr.vmem [resolvable:$true] %s880_s11 }
 0x112   : > { %v389_v30 = vsel %vm387_vm2, %v376_v27, 0  ;;  %380 = vperm.xlu0 %1108, %v377_v28   ;;  %v996_v32 = vld.sshfl [vmem:[#allocation2] sm:$0x33 pattern:$0x76325410]  ;;  %s1009_s7 = sshll.u32 %s876_s28, 6 }
 0x113   : > { %1016 = vmatpush3.bf16.msra.mxu0 %v389_v30  ;;  %v458_v33 = vcombine.high %v996_v32, %v996_v32  ;;  %v484_v34 = vsel %vm387_vm2, %v996_v32, 0  ;;  %s878_s16 = scalar_lea.hbm %s1656_s5, %s1009_s7  ;;  %s865_s17 = scalar_lea.sflag [#allocation7], %s1444_s30 }
 0x114   : > { %s1203_s29 = scalar_lea.vmem %s881_s11, 64  ;;  %s1308_s24 = smov [#allocation8]  }
 0x115   : > { %997 = vmatprep.subr.msk.bf16.mxu1 %vm387_vm2, %v458_v33  ;;  %p1204_p8 = scmp.ne.s32.totalorder %s881_s11, %s1203_s29  ;;  %s1207_s23 = sshll.u32 %s1308_s24, 4  ;;  %s1208_s23 = int_to_ptr.vmem [resolvable:$false] %s1207_s23 }
 0x116   : > { %1018 = vmatmul.mubr.msk.bf16.vlgmr.msra.gmra.mxu0 %vm383_vm4, %v375_v31  ;;  %504 = vmatpush1.bf16.msra.mxu1 %v484_v34  ;;  %s1209_s8 = scalar_lea.vmem %s1208_s23, 128  ;;  %p1210_p4 = scmp.lt.s32.totalorder %s881_s11, %s1208_s23 }
 0x117   : > { %p1205_p1 = pnand %p1204_p8, %p1407_p9  ;;  %p1211_p5 = scmp.lt.s32.totalorder %s1209_s8, %s1203_s29 }
 0x119   : > { %p1206_p2 = pneg %p1205_p1  ;;  %p1212_p6 = por %p1211_p5, %p1210_p4 }
 0x11b   : > { %p1213_p7 = pnand %p1212_p6, %p1206_p2 }
 0x18d   : > { %v381_v35 = vpop.permute.xlu0 %380 }
 0x1d6   : > { %v425_v36 = vpop.f32.mrf.mxu0 }
 0x1d7   : > { %v426_v37 = vadd.f32 %v425_v36, %v381_v35  ;;  %v1307_v35 = vmov 1065369472   ;;  %v1570_v36 = vld.sshfl [vmem:[#allocation3] sm:$0x33 pattern:$0x76325410] }
 0x1d8   : > { %v1019_v38 = vpop.f32.mrf.mxu0  ;;  %794 = vmatprep.mubr.bf16.mxu0 %v1307_v35 }
 0x1d9   : > { %v433_v39 = vpack.c.bf16 %v426_v37, %v426_v37  ;;  %v810_v37 = vcombine.high %v1570_v36, %v1570_v36 }
 0x1da   : > { %v428_v40 = vpop.f32.mrf.mxu0 }
 0x1db   : > { %434 = vxpose.xlu0.c.b16.start.end [1/1] (short) %v433_v39, 128 }
 0x1dc   : > { %v1020_v41 = vpop.f32.mrf.mxu0 }
 0x23d   : > { %v442_v42 = vpop.trf.xlu0 }
 0x23e   : > { %998 = vmatmul.mubr.msk.bf16.vlgmr.msra.gmra.mxu1 %vm383_vm4, %v442_v42 }
 0x23f   : > { %531 = vmatprep.mubr.bf16.mxu1 %v1306_v29 }
 0x241   : > { %v443_v43 = vpop.trf.xlu0 }
 0x245   : > { %v444_v44 = vpop.trf.xlu0 }
 0x246   : > { %999 = vmatmul.mubr.msk.bf16.gmra.mxu1 %vm383_vm4, %v443_v43 }
 0x247   : > { %541 = vmatprep.mubr.bf16.mxu1 %v1306_v29 }
 0x249   : > { %v445_v45 = vpop.trf.xlu0 }
 0x24d   : > { %v446_v46 = vpop.trf.xlu0 }
 0x24e   : > { %1000 = vmatmul.mubr.msk.bf16.gmra.mxu1 %vm383_vm4, %v444_v44 }
 0x24f   : > { %551 = vmatprep.mubr.bf16.mxu1 %v1306_v29 }
 0x251   : > { %v447_v47 = vpop.trf.xlu0 }
 0x255   : > { %v448_v48 = vpop.trf.xlu0 }
 0x256   : > { %1001 = vmatmul.mubr.msk.bf16.gmra.mxu1 %vm383_vm4, %v445_v45 }
 0x257   : > { %561 = vmatprep.mubr.bf16.mxu1 %v1306_v29 }
 0x259   : > { %v449_v49 = vpop.trf.xlu0 }
 0x25e   : > { %1002 = vmatmul.mubr.msk.bf16.gmra.mxu1 %vm383_vm4, %v446_v46 }
 0x25f   : > { %571 = vmatprep.mubr.bf16.mxu1 %v1306_v29 }
 0x266   : > { %1003 = vmatmul.mubr.msk.bf16.gmra.mxu1 %vm383_vm4, %v447_v47 }
 0x267   : > { %581 = vmatprep.mubr.bf16.mxu1 %v1306_v29 }
 0x26e   : > { %1004 = vmatmul.mubr.msk.bf16.gmra.mxu1 %vm383_vm4, %v448_v48 }
 0x26f   : > { %591 = vmatprep.mubr.bf16.mxu1 %v1306_v29 }
 0x276   : > { %1005 = vmatmul.mubr.msk.bf16.gmra.mxu1 %vm383_vm4, %v449_v49 }
 0x277   : > { %845 = vmatprep.mubr.bf16.mxu1 %v810_v37 }
 0x2fe   : > { %v1491_v50 = vpop.f32.mrf.mxu1 }
 0x300   : > { %v1493_v51 = vpop.f32.mrf.mxu1 }
 0x301   : > { %v602_v33 = vmax.f32 %v1491_v50, %v1493_v51 }
 0x302   : > { %v1495_v52 = vpop.f32.mrf.mxu1 }
 0x304   : > { %v1497_v53 = vpop.f32.mrf.mxu1 }
 0x305   : > { %v605_v34 = vmax.f32 %v1495_v52, %v1497_v53 }
 0x306   : > { %v1499_v54 = vpop.f32.mrf.mxu1 }
 0x308   : > { %v1501_v55 = vpop.f32.mrf.mxu1 }
 0x309   : > { %v608_v31 = vmax.f32 %v1499_v54, %v1501_v55 }
 0x30a   : > { %v1503_v56 = vpop.f32.mrf.mxu1 }
 0x30c   : > { %v1505_v57 = vpop.f32.mrf.mxu1 }
 0x30d   : > { %v611_v32 = vmax.f32 %v1503_v56, %v1505_v57 }
 0x30e   : > { %v1507_v58 = vpop.f32.mrf.mxu1 }
 0x310   : > { %v1509_v59 = vpop.f32.mrf.mxu1 }
 0x311   : > { %v614_v29 = vmax.f32 %v1507_v58, %v1509_v59 }
 0x312   : > { %v1511_v60 = vpop.f32.mrf.mxu1 }
 0x314   : > { %v1513_v61 = vpop.f32.mrf.mxu1 }
 0x315   : > { %v617_v30 = vmax.f32 %v1511_v60, %v1513_v61 }
 0x316   : > { %v1515_v62 = vpop.f32.mrf.mxu1 }
 0x318   : > { %v1517_v63 = vpop.f32.mrf.mxu1 }
 0x319   : > { %v620_v28 = vmax.f32 %v1515_v62, %v1517_v63 }
 0x31a   : > { %v1519_v0 = vpop.f32.mrf.mxu1 }
 0x31c   : > { %v1521_v1 = vpop.f32.mrf.mxu1 }
 0x31d   : > { %v623_v2 = vmax.f32 %v1519_v0, %v1521_v1 }
 0x31e   : > { %v1525_v3 = vpop.f32.mrf.mxu1 }
 0x31f   : > { %624 = vmax.xlane.f32.xlu0 %v623_v2 }
 0x320   : > { %v1527_v4 = vpop.f32.mrf.mxu1 }
 0x321   : > { %v626_v26 = vmax.f32 %v1525_v3, %v1527_v4 }
 0x322   : > { %v1529_v5 = vpop.f32.mrf.mxu1 }
 0x324   : > { %v1531_v6 = vpop.f32.mrf.mxu1 }
 0x325   : > { %v629_v27 = vmax.f32 %v1529_v5, %v1531_v6 }
 0x326   : > { %v1533_v7 = vpop.f32.mrf.mxu1 }
 0x328   : > { %v1535_v8 = vpop.f32.mrf.mxu1 }
 0x329   : > { %v632_v23 = vmax.f32 %v1533_v7, %v1535_v8 }
 0x32a   : > { %v1537_v9 = vpop.f32.mrf.mxu1 }
 0x32c   : > { %v1539_v10 = vpop.f32.mrf.mxu1 }
 0x32d   : > { %v635_v24 = vmax.f32 %v1537_v9, %v1539_v10 }
 0x32e   : > { %v583_v11 = vpop.f32.mrf.mxu1 }
 0x330   : > { %v585_v12 = vpop.f32.mrf.mxu1 }
 0x331   : > { %v638_v21 = vmax.f32 %v583_v11, %v585_v12 }
 0x332   : > { %v1541_v13 = vpop.f32.mrf.mxu1 }
 0x334   : > { %v1543_v14 = vpop.f32.mrf.mxu1 }
 0x335   : > { %v641_v22 = vmax.f32 %v1541_v13, %v1543_v14 }
 0x336   : > { %v593_v15 = vpop.f32.mrf.mxu1 }
 0x338   : > { %v595_v16 = vpop.f32.mrf.mxu1 }
 0x339   : > { %v644_v17 = vmax.f32 %v593_v15, %v595_v16 }
 0x33a   : > { %v597_v18 = vpop.f32.mrf.mxu1 }
 0x33b   : > { %645 = vmax.xlane.f32.xlu1 %v644_v17 }
 0x33c   : > { %v599_v19 = vpop.f32.mrf.mxu1 }
 0x33d   : > { %v647_v20 = vmax.f32 %v597_v18, %v599_v19 }
 0x33f   : > { %648 = vmax.xlane.f32.xlu1 %v647_v20 }
 0x343   : > { %639 = vmax.xlane.f32.xlu1 %v638_v21 }
 0x347   : > { %642 = vmax.xlane.f32.xlu1 %v641_v22 }
 0x34b   : > { %633 = vmax.xlane.f32.xlu1 %v632_v23 }
 0x34f   : > { %636 = vmax.xlane.f32.xlu1 %v635_v24 }
 0x353   : > { %627 = vmax.xlane.f32.xlu1 %v626_v26 }
 0x357   : > { %630 = vmax.xlane.f32.xlu1 %v629_v27 }
 0x35b   : > { %621 = vmax.xlane.f32.xlu1 %v620_v28 }
 0x35f   : > { %615 = vmax.xlane.f32.xlu1 %v614_v29 }
 0x363   : > { %618 = vmax.xlane.f32.xlu1 %v617_v30 }
 0x367   : > { %609 = vmax.xlane.f32.xlu1 %v608_v31 }
 0x36b   : > { %612 = vmax.xlane.f32.xlu1 %v611_v32 }
 0x36f   : > { %603 = vmax.xlane.f32.xlu1 %v602_v33 }
 0x373   : > { %606 = vmax.xlane.f32.xlu1 %v605_v34 }
 0x3c4   : > { %v646_v38 = vpop.xlane.xlu1 %645 }
 0x3c5   : > { %v678_v39 = vsub.f32 %v593_v15, %v646_v38  ;;  %v679_v40 = vsub.f32 %v595_v16, %v646_v38  ;;  %v625_v38 = vpop.xlane.xlu0 %624 }
 0x3c7   : > { %v738_v41 = vmul.f32 1.442695, %v678_v39  ;;  %v740_v42 = vmul.f32 1.442695, %v679_v40 }
 0x3c8   : > { %v649_v43 = vpop.xlane.xlu1 %648 }
 0x3c9   : > { %v680_v44 = vsub.f32 %v597_v18, %v649_v43  ;;  %v681_v45 = vsub.f32 %v599_v19, %v649_v43  ;;  %1109 = vpow2.f32 %v738_v41 }
 0x3ca   : > { %1111 = vpow2.f32 %v740_v42  ;;  %v665_v42 = vsub.f32 %v1521_v1, %v625_v38  ;;  %v664_v1 = vsub.f32 %v1519_v0, %v625_v38 }
 0x3cb   : > { %v742_v46 = vmul.f32 1.442695, %v680_v44  ;;  %v744_v47 = vmul.f32 1.442695, %v681_v45 }
 0x3cc   : > { %v640_v48 = vpop.xlane.xlu1 %639 }
 0x3cd   : > { %1113 = vpow2.f32 %v742_v46  ;;  %v674_v49 = vsub.f32 %v583_v11, %v640_v48  ;;  %v675_v2 = vsub.f32 %v585_v12, %v640_v48 }
 0x3ce   : > { %1115 = vpow2.f32 %v744_v47 }
 0x3cf   : > { %v730_v17 = vmul.f32 1.442695, %v674_v49  ;;  %v732_v20 = vmul.f32 1.442695, %v675_v2  ;;  %v712_v2 = vmul.f32 1.442695, %v665_v42 }
 0x3d0   : > { %v643_v21 = vpop.xlane.xlu1 %642 }
 0x3d1   : > { %v676_v15 = vsub.f32 %v1541_v13, %v643_v21  ;;  %v677_v16 = vsub.f32 %v1543_v14, %v643_v21  ;;  %1117 = vpow2.f32 %v730_v17 }
 0x3d2   : > { %1119 = vpow2.f32 %v732_v20 }
 0x3d3   : > { %v734_v22 = vmul.f32 1.442695, %v676_v15  ;;  %v736_v18 = vmul.f32 1.442695, %v677_v16 }
 0x3d4   : > { %v634_v19 = vpop.xlane.xlu1 %633 }
 0x3d5   : > { %1121 = vpow2.f32 %v734_v22  ;;  %v670_v23 = vsub.f32 %v1533_v7, %v634_v19  ;;  %v671_v24 = vsub.f32 %v1535_v8, %v634_v19  ;;  %v710_v19 = vmul.f32 1.442695, %v664_v1 }
 0x3d6   : > { %1123 = vpow2.f32 %v736_v18  ;;  %v1110_v12 = vpop.eup %1109 }
 0x3d7   : > { %v722_v11 = vmul.f32 1.442695, %v670_v23  ;;  %v724_v26 = vmul.f32 1.442695, %v671_v24  ;;  %v1112_v28 = vpop.eup %1111 }
 0x3d8   : > { %v637_v27 = vpop.xlane.xlu1 %636 }
 0x3d9   : > { %v672_v13 = vsub.f32 %v1537_v9, %v637_v27  ;;  %v673_v14 = vsub.f32 %v1539_v10, %v637_v27  ;;  %1125 = vpow2.f32 %v722_v11 }
 0x3da   : > { %v1114_v29 = vpop.eup %1113  ;;  %1127 = vpow2.f32 %v724_v26 }
 0x3db   : > { %v1116_v30 = vpop.eup %1115  ;;  %v726_v31 = vmul.f32 1.442695, %v672_v13  ;;  %v728_v32 = vmul.f32 1.442695, %v673_v14  ;;  %v760_v33 = vpack.c.bf16 %v1114_v29, %v1110_v12 }
 0x3dc   : > { %v628_v7 = vpop.xlane.xlu1 %627  ;;  %v761_v34 = vpack.c.bf16 %v1116_v30, %v1112_v28 }
 0x3dd   : > { %1129 = vpow2.f32 %v726_v31  ;;  %v666_v8 = vsub.f32 %v1525_v3, %v628_v7  ;;  %v667_v37 = vsub.f32 %v1527_v4, %v628_v7 }
 0x3de   : > { %1131 = vpow2.f32 %v728_v32  ;;  %762 = vmatprep.subr.bf16.mxu0 %v761_v34  ;;  %813 = vmatprep.subr.bf16.mxu1 %v761_v34  ;;  %v1118_v10 = vpop.eup %1117 }
 0x3df   : > { %v714_v9 = vmul.f32 1.442695, %v666_v8  ;;  %763 = vmatpush1.bf16.xpose.msra.mxu0 %v760_v33  ;;  %814 = vmatpush1.bf16.xpose.msra.mxu1 %v760_v33  ;;  %v716_v39 = vmul.f32 1.442695, %v667_v37  ;;  %v1120_v41 = vpop.eup %1119 }
 0x3e0   : > { %v631_v40 = vpop.xlane.xlu1 %630 }
 0x3e1   : > { %v668_v43 = vsub.f32 %v1529_v5, %v631_v40  ;;  %v669_v44 = vsub.f32 %v1531_v6, %v631_v40  ;;  %1133 = vpow2.f32 %v714_v9 }
 0x3e2   : > { %v1122_v3 = vpop.eup %1121  ;;  %1135 = vpow2.f32 %v716_v39 }
 0x3e3   : > { %v1124_v45 = vpop.eup %1123  ;;  %v718_v4 = vmul.f32 1.442695, %v668_v43  ;;  %v720_v46 = vmul.f32 1.442695, %v669_v44  ;;  %v758_v47 = vpack.c.bf16 %v1122_v3, %v1118_v10 }
 0x3e4   : > { %v622_v48 = vpop.xlane.xlu1 %621  ;;  %v759_v49 = vpack.c.bf16 %v1124_v45, %v1120_v41 }
 0x3e5   : > { %1137 = vpow2.f32 %v718_v4  ;;  %v662_v17 = vsub.f32 %v1515_v62, %v622_v48  ;;  %v663_v20 = vsub.f32 %v1517_v63, %v622_v48 }
 0x3e6   : > { %1139 = vpow2.f32 %v720_v46  ;;  %764 = vmatprep.subr.bf16.mxu0 %v759_v49  ;;  %815 = vmatprep.subr.bf16.mxu1 %v759_v49  ;;  %v1126_v6 = vpop.eup %1125 }
 0x3e7   : > { %v708_v5 = vmul.f32 1.442695, %v663_v20  ;;  %765 = vmatpush1.bf16.xpose.msra.mxu0 %v758_v47  ;;  %816 = vmatpush1.bf16.xpose.msra.mxu1 %v758_v47  ;;  %v706_v21 = vmul.f32 1.442695, %v662_v17  ;;  %v1128_v16 = vpop.eup %1127  ;;  %1141 = vpow2.f32 %v712_v2 }
 0x3e8   : > { %v616_v15 = vpop.xlane.xlu1 %615 }
 0x3e9   : > { %v659_v22 = vsub.f32 %v1509_v59, %v616_v15  ;;  %1143 = vpow2.f32 %v708_v5  ;;  %v658_v26 = vsub.f32 %v1507_v58, %v616_v15 }
 0x3ea   : > { %v1130_v18 = vpop.eup %1129  ;;  %1145 = vpow2.f32 %v706_v21 }
 0x3eb   : > { %v1132_v62 = vpop.eup %1131  ;;  %v756_v63 = vpack.c.bf16 %v1130_v18, %v1126_v6  ;;  %v700_v24 = vmul.f32 1.442695, %v659_v22  ;;  %1147 = vpow2.f32 %v710_v19  ;;  %v698_v31 = vmul.f32 1.442695, %v658_v26 }
 0x3ec   : > { %v619_v0 = vpop.xlane.xlu1 %618  ;;  %v757_v23 = vpack.c.bf16 %v1132_v62, %v1128_v16 }
 0x3ed   : > { %v660_v11 = vsub.f32 %v1511_v60, %v619_v0  ;;  %v661_v12 = vsub.f32 %v1513_v61, %v619_v0  ;;  %1149 = vpow2.f32 %v700_v24 }
 0x3ee   : > { %766 = vmatprep.subr.bf16.mxu0 %v757_v23  ;;  %817 = vmatprep.subr.bf16.mxu1 %v757_v23  ;;  %v1134_v59 = vpop.eup %1133 }
 0x3ef   : > { %v704_v27 = vmul.f32 1.442695, %v661_v12  ;;  %767 = vmatpush1.bf16.xpose.msra.mxu0 %v756_v63  ;;  %818 = vmatpush1.bf16.xpose.msra.mxu1 %v756_v63  ;;  %v1136_v13 = vpop.eup %1135  ;;  %v702_v14 = vmul.f32 1.442695, %v660_v11  ;;  %v857_v12 = vlaneseq }
 0x3f0   : > { %v610_v28 = vpop.xlane.xlu1 %609 }
 0x3f1   : > { %v655_v29 = vsub.f32 %v1501_v55, %v610_v28  ;;  %1151 = vpow2.f32 %v704_v27  ;;  %v654_v55 = vsub.f32 %v1499_v54, %v610_v28  ;;  %v855_v28 = vstv %s853_s19 }
 0x3f2   : > { %v1138_v30 = vpop.eup %1137  ;;  %1153 = vpow2.f32 %v702_v14 }
 0x3f3   : > { %v1140_v60 = vpop.eup %1139  ;;  %v754_v61 = vpack.c.bf16 %v1138_v30, %v1134_v59  ;;  %v692_v7 = vmul.f32 1.442695, %v655_v29  ;;  %1155 = vpow2.f32 %v698_v31  ;;  %v858_v59 = vshrl.u32 %v857_v12, 7 }
 0x3f4   : > { %v613_v32 = vpop.xlane.xlu1 %612  ;;  %v755_v33 = vpack.c.bf16 %v1140_v60, %v1136_v13  ;;  %v1142_v8 = vpop.eup %1141 }
 0x3f5   : > { %v656_v58 = vsub.f32 %v1503_v56, %v613_v32  ;;  %v657_v34 = vsub.f32 %v1505_v57, %v613_v32  ;;  %1157 = vpow2.f32 %v692_v7  ;;  %v690_v57 = vmul.f32 1.442695, %v654_v55 }
 0x3f6   : > { %768 = vmatprep.subr.bf16.mxu0 %v755_v33  ;;  %819 = vmatprep.subr.bf16.mxu1 %v755_v33  ;;  %v1144_v37 = vpop.eup %1143 }
 0x3f7   : > { %v696_v38 = vmul.f32 1.442695, %v657_v34  ;;  %769 = vmatpush1.bf16.xpose.msra.mxu0 %v754_v61  ;;  %820 = vmatpush1.bf16.xpose.msra.mxu1 %v754_v61  ;;  %v753_v10 = vpack.c.bf16 %v1142_v8, %v1144_v37  ;;  %v1146_v39 = vpop.eup %1145  ;;  %v694_v40 = vmul.f32 1.442695, %v656_v58 }
 0x3f8   : > { %v604_v9 = vpop.xlane.xlu1 %603  ;;  %v1148_v56 = vpop.eup %1147 }
 0x3f9   : > { %v651_v41 = vsub.f32 %v1493_v51, %v604_v9  ;;  %1159 = vpow2.f32 %v696_v38  ;;  %770 = vmatprep.subr.bf16.mxu0 %v753_v10  ;;  %821 = vmatprep.subr.bf16.mxu1 %v753_v10  ;;  %v752_v43 = vpack.c.bf16 %v1148_v56, %v1146_v39  ;;  %v650_v46 = vsub.f32 %v1491_v50, %v604_v9 }
 0x3fa   : > { %1161 = vpow2.f32 %v694_v40  ;;  %v1150_v45 = vpop.eup %1149 }
 0x3fb   : > { %v684_v44 = vmul.f32 1.442695, %v651_v41  ;;  %1163 = vpow2.f32 %v690_v57  ;;  %v682_v2 = vmul.f32 1.442695, %v650_v46 }
 0x3fc   : > { %v607_v42 = vpop.xlane.xlu1 %606 }
 0x3fd   : > { %v652_v54 = vsub.f32 %v1495_v52, %v607_v42  ;;  %v653_v3 = vsub.f32 %v1497_v53, %v607_v42  ;;  %1165 = vpow2.f32 %v684_v44 }
 0x3fe   : > { %v1152_v4 = vpop.eup %1151 }
 0x3ff   : > { %v688_v47 = vmul.f32 1.442695, %v653_v3  ;;  %771 = vmatpush1.bf16.xpose.msra.mxu0 %v752_v43  ;;  %822 = vmatpush1.bf16.xpose.msra.mxu1 %v752_v43  ;;  %v751_v51 = vpack.c.bf16 %v1152_v4, %v1150_v45  ;;  %v686_v48 = vmul.f32 1.442695, %v652_v54  ;;  %v1154_v49 = vpop.eup %1153 }
 0x400   : > { %v1156_v17 = vpop.eup %1155 }
 0x401   : > { %1167 = vpow2.f32 %v688_v47  ;;  %772 = vmatprep.subr.bf16.mxu0 %v751_v51  ;;  %823 = vmatprep.subr.bf16.mxu1 %v751_v51  ;;  %v750_v52 = vpack.c.bf16 %v1154_v49, %v1156_v17 }
 0x402   : > { %1169 = vpow2.f32 %v686_v48  ;;  %v1158_v53 = vpop.eup %1157 }
 0x403   : > { %1171 = vpow2.f32 %v682_v2 }
 0x406   : > { %v1160_v20 = vpop.eup %1159 }
 0x407   : > { %773 = vmatpush1.bf16.xpose.msra.mxu0 %v750_v52  ;;  %824 = vmatpush1.bf16.xpose.msra.mxu1 %v750_v52  ;;  %v749_v50 = vpack.c.bf16 %v1160_v20, %v1158_v53  ;;  %v1162_v1 = vpop.eup %1161 }
 0x408   : > { %v1164_v5 = vpop.eup %1163 }
 0x409   : > { %774 = vmatprep.subr.bf16.mxu0 %v749_v50  ;;  %825 = vmatprep.subr.bf16.mxu1 %v749_v50  ;;  %v748_v6 = vpack.c.bf16 %v1162_v1, %v1164_v5 }
 0x40a   : > { %v1166_v21 = vpop.eup %1165 }
 0x40e   : > { %v1168_v15 = vpop.eup %1167 }
 0x40f   : > { %775 = vmatpush1.bf16.xpose.msra.mxu0 %v748_v6  ;;  %826 = vmatpush1.bf16.xpose.msra.mxu1 %v748_v6  ;;  %v747_v16 = vpack.c.bf16 %v1168_v15, %v1166_v21  ;;  %v1170_v22 = vpop.eup %1169 }
 0x410   : > { %v1172_v18 = vpop.eup %1171 }
 0x411   : > { %776 = vmatprep.subr.bf16.mxu0 %v747_v16  ;;  %827 = vmatprep.subr.bf16.mxu1 %v747_v16  ;;  %v746_v19 = vpack.c.bf16 %v1170_v22, %v1172_v18 }
 0x417   : > { %777 = vmatpush1.bf16.xpose.msra.mxu0 %v746_v19  ;;  %828 = vmatpush1.bf16.xpose.msra.mxu1 %v746_v19 }
 0x41e   : > { %795 = vmatmul.mubr.bf16.vlgmr.msra.gmra.mxu0 %v1307_v35  ;;  %846 = vmatmul.mubr.bf16.vlgmr.msra.gmra.mxu1 %v1570_v36  ;;  %v859_v35 = vsub.s32 0, %v858_v59 }
 0x4de   : > { %v796_v62 = vpop.f32.mrf.mxu0  ;;  %v847_v63 = vpop.f32.mrf.mxu1 }
 0x4df   : > { %1173 = vrcp.f32 %v796_v62 }
 0x4e0   : > { %v798_v0 = vpop.f32.mrf.mxu0  ;;  %v849_v23 = vpop.f32.mrf.mxu1 }
 0x4e2   : > { %v799_v24 = vpop.f32.mrf.mxu0  ;;  %v850_v11 = vpop.f32.mrf.mxu1 }
 0x4e4   : > { %v800_v26 = vpop.f32.mrf.mxu0  ;;  %v851_v27 = vpop.f32.mrf.mxu1 }
 0x4ec   : > { %v1174_v36 = vpop.eup %1173 }
 0x4ed   : > { %v856_v13 = vmul.f32 %v1174_v36, %v855_v28 }
 0x4ef   : > { %v860_v14 = vrot.slane %v856_v13, %v859_v35 }
 0x4f1   : > { %v861_v29 = vmul.f32 %v860_v14, %v847_v63 }
 0x4f3   : > { %v862_v30 = vadd.f32 %v861_v29, %v1469_v25 }
 0x4f5   : > { %863 = vst [vmem:[%s1459_s6] sm:$0xf] %v862_v30 }
 0x4f6   : > { %1216 = shalt.err (!%p1213_p7)
}
 0x4f7   : > { %s1217_s14 = scalar_lea.hbm %s878_s16, 64  ;;  %s1221_s18 = scalar_lea.hbm %s1656_s5, 256 }
 0x4f8   : > { %p1218_p10 = scmp.ne.s32.totalorder %s878_s16, %s1217_s14  ;;  %p1222_p13 = scmp.lt.s32.totalorder %s878_s16, %s1656_s5 }
 0x4f9   : > { %p1223_p0 = scmp.lt.s32.totalorder %s1221_s18, %s1217_s14 }
 0x4fa   : > { %p1219_p11 = pnand %p1218_p10, %p1407_p9 }
 0x4fb   : > { %p1224_p12 = por %p1223_p0, %p1222_p13 }
 0x4fc   : > { %p1220_p3 = pneg %p1219_p11 }
 0x4fe   : > { %p1225_p8 = pnand %p1224_p12, %p1220_p3 }
 0x500   : > { %1228 = shalt.err (!%p1225_p8)
}
 0x501   : > { %1023 = dma.vmem_to_hbm [thread:$0]  (%p1407_p9), %s881_s11, 64, %s878_s16, %s865_s17  }
 0x502 PF: > { %p1034_p1 = scmp.ge.s32.totalorder %s1299_s27, 2  ;;  %s892_s28 = sand.u32 1, %s1271_s20  }
 0x503   : > { %p1666_p2 = scmp.ne.s32.totalorder %s1664_s13, 0  ;;  %s893_s7 = scalar_lea.sflag [#allocation7], %s892_s28 }
 0x505   : > { %p1030_p4 = pnand %p1034_p1, %p1666_p2 }
 0x507   : > { %p1031_p5 = pneg %p1030_p4 }
 0x509   : > { %1266 = dma.done.wait (%p1031_p5), %s893_s7, 64  }
 0x50a   : > { %1268 = vsyncadd (%p1031_p5), %s893_s7, 4294967232  ;;  %s22_s27 = sadd.s32 1, %s1299_s27   ;;  %s1667_s10 = sld [smem:[#allocation11_spill]] }
 0x50b   : > { %p19_p6 = scmp.ge.s32.totalorder %s22_s27, 6   ;;  %s1668_s11 = sld [smem:[#allocation12_spill]] }
 0x50c   : > { %s1669_s20 = smov %s1275_s21  ;;  %s1670_s21 = smov %s1279_s22 }
 0x50d   : > { %s1671_s22 = smov %s1420_s15  ;;  %s1672_s23 = smov %s1291_s25 }
 0x50e   : > { %s1673_s24 = smov %s1295_s26  ;;  %21 = sbr.rel (!%p19_p6) target bundleno = 9 (0x9), region = 92 }
 0x510   : > { %s1674_s25 = smov %s1667_s10 }
 0x511   : > { %s1675_s26 = smov %s1668_s11 }
 0x513   :  { %898 = vsyncpa [#allocation6], 1 }
 0x514   :  { %900 = vsyncpa [#allocation6 + $0x1], 1 }
 0x515   :  { %901 = vsyncpa [#allocation7], 1 }
 0x516   :  { %903 = vsyncpa [#allocation7 + $0x1], 1 }

</bundles_post_ra>
